<compile_context>
chip_gen: v5e
topology: v5e:2x2
jax: 0.10.0
libtpu: 0.0.40
codegen_flags: <defaults>
</compile_context>

<pallas_src>
import math

import jax
import jax.numpy as jnp
from jax.experimental import pallas as pl
from jax.experimental.pallas import tpu as pltpu

D_IN = 9      # flattened tic-tac-toe board
D_HID = 32
D_OUT = 9
BN_EPS = 1e-5

_INV_SQRT2 = 1.0 / math.sqrt(2.0)


def _erf_poly(x):
    """Abramowitz & Stegun 7.1.26 erf approximation (|err| <= 1.5e-7)."""
    p = 0.3275911
    a1, a2, a3, a4, a5 = (0.254829592, -0.284496736, 1.421413741,
                          -1.453152027, 1.061405429)
    sgn = jnp.where(x >= 0.0, 1.0, -1.0)
    ax = jnp.abs(x)
    t = 1.0 / (1.0 + p * ax)
    poly = t * (a1 + t * (a2 + t * (a3 + t * (a4 + t * a5))))
    return sgn * (1.0 - poly * jnp.exp(-ax * ax))


def _gelu_exact(x):
    """PyTorch nn.GELU() default: 0.5*x*(1+erf(x/sqrt(2)))."""
    return 0.5 * x * (1.0 + _erf_poly(x * _INV_SQRT2))


def mlp_kernel(x_ref,
               w1_ref, b1_ref, s1_ref, t1_ref,
               w2_ref, b2_ref, s2_ref, t2_ref,
               w3_ref, b3_ref,
               o_ref):
    x = x_ref[...]                                                # (Bt, 9)
    h = jnp.dot(x, w1_ref[...], preferred_element_type=jnp.float32) + b1_ref[...]
    h = _gelu_exact(h)
    h = h * s1_ref[...] + t1_ref[...]                             # BN1 (eval, folded)
    h = jnp.dot(h, w2_ref[...], preferred_element_type=jnp.float32) + b2_ref[...]
    h = _gelu_exact(h)
    h = h * s2_ref[...] + t2_ref[...]                             # BN2 (eval, folded)
    o_ref[...] = (jnp.dot(h, w3_ref[...], preferred_element_type=jnp.float32)
                  + b3_ref[...])                                  # (Bt, 9)


def _round_up(n, m):
    return ((n + m - 1) // m) * m


def ff_ttt_forward(x, kernel_params, *, block_b=1024):
    """x: (B, 9) float32 -> (B, 9) float32 (matches PyTorch forward)."""
    B, F = x.shape
    assert F == D_IN
    bt = min(block_b, _round_up(B, 8))      # rows per grid step, multiple of 8
    Bp = _round_up(B, bt)
    if Bp != B:
        x = jnp.pad(x, ((0, Bp - B), (0, 0)))

    def full_spec(arr):
        nd = arr.ndim
        return pl.BlockSpec(arr.shape, lambda i, nd=nd: (0,) * nd)

    out = pl.pallas_call(
        mlp_kernel,
        out_shape=jax.ShapeDtypeStruct((Bp, D_OUT), jnp.float32),
        grid=(Bp // bt,),
        in_specs=[pl.BlockSpec((bt, D_IN), lambda i: (i, 0))]
                 + [full_spec(p) for p in kernel_params],
        out_specs=pl.BlockSpec((bt, D_OUT), lambda i: (i, 0)),
        compiler_params=pltpu.CompilerParams(
            dimension_semantics=("parallel",)),
    )(x, *kernel_params)
    return out[:B]


def init_params(key):
    """PyTorch-style init. Returns (kernel_params, raw_params_dict)."""
    ks = jax.random.split(key, 5)

    def linear(k, fan_in, fan_out):
        kw, kb = jax.random.split(k)
        bound = 1.0 / math.sqrt(fan_in)
        w = jax.random.uniform(kw, (fan_in, fan_out), jnp.float32, -bound, bound)
        b = jax.random.uniform(kb, (1, fan_out), jnp.float32, -bound, bound)
        return w, b

    def batchnorm(k, n):
        # Non-trivial running stats / affine params so the BN path is tested.
        k0, k1, k2, k3 = jax.random.split(k, 4)
        gamma = jax.random.uniform(k0, (1, n), jnp.float32, 0.8, 1.2)
        beta = 0.1 * jax.random.normal(k1, (1, n), jnp.float32)
        rmean = 0.1 * jax.random.normal(k2, (1, n), jnp.float32)
        rvar = jax.random.uniform(k3, (1, n), jnp.float32, 0.5, 1.5)
        return gamma, beta, rmean, rvar

    w1, b1 = linear(ks[0], D_IN, D_HID)
    g1, be1, m1, v1 = batchnorm(ks[1], D_HID)
    w2, b2 = linear(ks[2], D_HID, D_HID)
    g2, be2, m2, v2 = batchnorm(ks[3], D_HID)
    w3, b3 = linear(ks[4], D_HID, D_OUT)

    def fold(g, be, m, v):
        s = g * jax.lax.rsqrt(v + BN_EPS)
        return s, be - m * s

    s1, t1 = fold(g1, be1, m1, v1)
    s2, t2 = fold(g2, be2, m2, v2)

    kernel_params = (w1, b1, s1, t1, w2, b2, s2, t2, w3, b3)
    raw = dict(w1=w1, b1=b1, g1=g1, be1=be1, m1=m1, v1=v1,
               w2=w2, b2=b2, g2=g2, be2=be2, m2=m2, v2=v2,
               w3=w3, b3=b3)
    return kernel_params, raw


def reference_forward(x, raw):
    """Pure-JAX reference of the PyTorch forward (eval mode), true erf GELU."""
    def bn(h, g, be, m, v):
        return (h - m) * jax.lax.rsqrt(v + BN_EPS) * g + be

    h = x @ raw['w1'] + raw['b1']
    h = jax.nn.gelu(h, approximate=False)
    h = bn(h, raw['g1'], raw['be1'], raw['m1'], raw['v1'])
    h = h @ raw['w2'] + raw['b2']
    h = jax.nn.gelu(h, approximate=False)
    h = bn(h, raw['g2'], raw['be2'], raw['m2'], raw['v2'])
    return h @ raw['w3'] + raw['b3']        # (B, 9); .squeeze(1) is a no-op


if __name__ == "__main__":
    key = jax.random.PRNGKey(0)
    kx, kp = jax.random.split(key)

    B = 37                                   # small, non-multiple-of-8 batch
    x = jax.random.normal(kx, (B, D_IN), jnp.float32)
    kernel_params, raw = init_params(kp)

    y_ref = reference_forward(x, raw)

    # Single-block path (whole padded batch in one grid step).
    y = jax.block_until_ready(ff_ttt_forward(x, kernel_params))
    assert y.shape == (B, D_OUT), y.shape
    assert jnp.allclose(y, y_ref, atol=1e-4, rtol=1e-4)

    # Multi-block path (3 grid steps of 16 rows each) for coverage.
    y2 = jax.block_until_ready(ff_ttt_forward(x, kernel_params, block_b=16))
    assert y2.shape == (B, D_OUT), y2.shape
    assert jnp.allclose(y2, y_ref, atol=1e-4, rtol=1e-4)

    print("KERNEL_OK")
</pallas_src>

<mosaic_0001>
module attributes {stable_mosaic.version = 11 : i64} {
  func.func @mlp_kernel(%arg0: i32, %arg1: memref<40x9xf32, #tpu.memory_space<vmem>>, %arg2: memref<9x32xf32, #tpu.memory_space<vmem>>, %arg3: memref<1x32xf32, #tpu.memory_space<vmem>>, %arg4: memref<1x32xf32, #tpu.memory_space<vmem>>, %arg5: memref<1x32xf32, #tpu.memory_space<vmem>>, %arg6: memref<32x32xf32, #tpu.memory_space<vmem>>, %arg7: memref<1x32xf32, #tpu.memory_space<vmem>>, %arg8: memref<1x32xf32, #tpu.memory_space<vmem>>, %arg9: memref<1x32xf32, #tpu.memory_space<vmem>>, %arg10: memref<32x9xf32, #tpu.memory_space<vmem>>, %arg11: memref<1x9xf32, #tpu.memory_space<vmem>>, %arg12: memref<40x9xf32, #tpu.memory_space<vmem>>) attributes {dimension_semantics = [#tpu.dimension_semantics<parallel>], iteration_bounds = array<i64: 1>, scalar_prefetch = 0 : i64, scratch_operands = 0 : i64, tpu.core_type = #tpu.core_type<tc>, window_params = [{transform_indices = @transform_0, window_bounds = array<i64: 40, 9>}, {pipeline_mode = #tpu.pipeline_mode<synchronous>, transform_indices = @transform_1, window_bounds = array<i64: 9, 32>}, {pipeline_mode = #tpu.pipeline_mode<synchronous>, transform_indices = @transform_2, window_bounds = array<i64: 1, 32>}, {pipeline_mode = #tpu.pipeline_mode<synchronous>, transform_indices = @transform_3, window_bounds = array<i64: 1, 32>}, {pipeline_mode = #tpu.pipeline_mode<synchronous>, transform_indices = @transform_4, window_bounds = array<i64: 1, 32>}, {pipeline_mode = #tpu.pipeline_mode<synchronous>, transform_indices = @transform_5, window_bounds = array<i64: 32, 32>}, {pipeline_mode = #tpu.pipeline_mode<synchronous>, transform_indices = @transform_6, window_bounds = array<i64: 1, 32>}, {pipeline_mode = #tpu.pipeline_mode<synchronous>, transform_indices = @transform_7, window_bounds = array<i64: 1, 32>}, {pipeline_mode = #tpu.pipeline_mode<synchronous>, transform_indices = @transform_8, window_bounds = array<i64: 1, 32>}, {pipeline_mode = #tpu.pipeline_mode<synchronous>, transform_indices = @transform_9, window_bounds = array<i64: 32, 9>}, {pipeline_mode = #tpu.pipeline_mode<synchronous>, transform_indices = @transform_10, window_bounds = array<i64: 1, 9>}, {transform_indices = @transform_11, window_bounds = array<i64: 40, 9>}]} {
    %c0 = arith.constant 0 : index
    %c0_0 = arith.constant 0 : index
    %0 = vector.load %arg1[%c0, %c0_0] : memref<40x9xf32, #tpu.memory_space<vmem>>, vector<40x9xf32>
    %c0_1 = arith.constant 0 : index
    %c0_2 = arith.constant 0 : index
    %1 = vector.load %arg2[%c0_1, %c0_2] : memref<9x32xf32, #tpu.memory_space<vmem>>, vector<9x32xf32>
    %cst = arith.constant dense<0.000000e+00> : vector<40x32xf32>
    %2 = tpu.matmul %0, %1, %cst {dimension_numbers = #tpu.dot_dimension_numbers<[1], [0], [0], [1], [0, 0, 1, 1], [], []>} : vector<40x9xf32>, vector<9x32xf32>, vector<40x32xf32> -> vector<40x32xf32>
    %c0_3 = arith.constant 0 : index
    %c0_4 = arith.constant 0 : index
    %3 = vector.load %arg3[%c0_3, %c0_4] : memref<1x32xf32, #tpu.memory_space<vmem>>, vector<1x32xf32>
    %4 = vector.broadcast %3 : vector<1x32xf32> to vector<40x32xf32>
    %5 = arith.addf %2, %4 : vector<40x32xf32>
    %cst_5 = arith.constant 5.000000e-01 : f32
    %6 = vector.broadcast %cst_5 : f32 to vector<40x32xf32>
    %7 = arith.mulf %6, %5 : vector<40x32xf32>
    %cst_6 = arith.constant 0.707106769 : f32
    %8 = vector.broadcast %cst_6 : f32 to vector<40x32xf32>
    %9 = arith.mulf %5, %8 : vector<40x32xf32>
    %cst_7 = arith.constant 0.000000e+00 : f32
    %10 = vector.broadcast %cst_7 : f32 to vector<40x32xf32>
    %11 = arith.cmpf oge, %9, %10 : vector<40x32xf32>
    %cst_8 = arith.constant 1.000000e+00 : f32
    %cst_9 = arith.constant -1.000000e+00 : f32
    %12 = vector.broadcast %cst_8 : f32 to vector<40x32xf32>
    %13 = vector.broadcast %cst_9 : f32 to vector<40x32xf32>
    %14 = arith.select %11, %12, %13 : vector<40x32xi1>, vector<40x32xf32>
    %15 = math.absf %9 : vector<40x32xf32>
    %cst_10 = arith.constant 0.327591091 : f32
    %16 = vector.broadcast %cst_10 : f32 to vector<40x32xf32>
    %17 = arith.mulf %16, %15 : vector<40x32xf32>
    %cst_11 = arith.constant 1.000000e+00 : f32
    %18 = vector.broadcast %cst_11 : f32 to vector<40x32xf32>
    %19 = arith.addf %18, %17 : vector<40x32xf32>
    %cst_12 = arith.constant 1.000000e+00 : f32
    %20 = vector.broadcast %cst_12 : f32 to vector<40x32xf32>
    %21 = arith.divf %20, %19 : vector<40x32xf32>
    %cst_13 = arith.constant 1.06140542 : f32
    %22 = vector.broadcast %cst_13 : f32 to vector<40x32xf32>
    %23 = arith.mulf %21, %22 : vector<40x32xf32>
    %cst_14 = arith.constant -1.45315206 : f32
    %24 = vector.broadcast %cst_14 : f32 to vector<40x32xf32>
    %25 = arith.addf %24, %23 : vector<40x32xf32>
    %26 = arith.mulf %21, %25 : vector<40x32xf32>
    %cst_15 = arith.constant 1.42141378 : f32
    %27 = vector.broadcast %cst_15 : f32 to vector<40x32xf32>
    %28 = arith.addf %27, %26 : vector<40x32xf32>
    %29 = arith.mulf %21, %28 : vector<40x32xf32>
    %cst_16 = arith.constant -0.284496725 : f32
    %30 = vector.broadcast %cst_16 : f32 to vector<40x32xf32>
    %31 = arith.addf %30, %29 : vector<40x32xf32>
    %32 = arith.mulf %21, %31 : vector<40x32xf32>
    %cst_17 = arith.constant 0.254829586 : f32
    %33 = vector.broadcast %cst_17 : f32 to vector<40x32xf32>
    %34 = arith.addf %33, %32 : vector<40x32xf32>
    %35 = arith.mulf %21, %34 : vector<40x32xf32>
    %cst_18 = arith.constant 0.000000e+00 : f32
    %36 = vector.broadcast %cst_18 : f32 to vector<40x32xf32>
    %37 = arith.subf %36, %15 : vector<40x32xf32>
    %38 = arith.mulf %37, %15 : vector<40x32xf32>
    %39 = math.exp %38 : vector<40x32xf32>
    %40 = arith.mulf %35, %39 : vector<40x32xf32>
    %cst_19 = arith.constant 1.000000e+00 : f32
    %41 = vector.broadcast %cst_19 : f32 to vector<40x32xf32>
    %42 = arith.subf %41, %40 : vector<40x32xf32>
    %43 = arith.mulf %14, %42 : vector<40x32xf32>
    %cst_20 = arith.constant 1.000000e+00 : f32
    %44 = vector.broadcast %cst_20 : f32 to vector<40x32xf32>
    %45 = arith.addf %44, %43 : vector<40x32xf32>
    %46 = arith.mulf %7, %45 : vector<40x32xf32>
    %c0_21 = arith.constant 0 : index
    %c0_22 = arith.constant 0 : index
    %47 = vector.load %arg4[%c0_21, %c0_22] : memref<1x32xf32, #tpu.memory_space<vmem>>, vector<1x32xf32>
    %48 = vector.broadcast %47 : vector<1x32xf32> to vector<40x32xf32>
    %49 = arith.mulf %46, %48 : vector<40x32xf32>
    %c0_23 = arith.constant 0 : index
    %c0_24 = arith.constant 0 : index
    %50 = vector.load %arg5[%c0_23, %c0_24] : memref<1x32xf32, #tpu.memory_space<vmem>>, vector<1x32xf32>
    %51 = vector.broadcast %50 : vector<1x32xf32> to vector<40x32xf32>
    %52 = arith.addf %49, %51 : vector<40x32xf32>
    %c0_25 = arith.constant 0 : index
    %c0_26 = arith.constant 0 : index
    %53 = vector.load %arg6[%c0_25, %c0_26] : memref<32x32xf32, #tpu.memory_space<vmem>>, vector<32x32xf32>
    %cst_27 = arith.constant dense<0.000000e+00> : vector<40x32xf32>
    %54 = tpu.matmul %52, %53, %cst_27 {dimension_numbers = #tpu.dot_dimension_numbers<[1], [0], [0], [1], [0, 0, 1, 1], [], []>} : vector<40x32xf32>, vector<32x32xf32>, vector<40x32xf32> -> vector<40x32xf32>
    %c0_28 = arith.constant 0 : index
    %c0_29 = arith.constant 0 : index
    %55 = vector.load %arg7[%c0_28, %c0_29] : memref<1x32xf32, #tpu.memory_space<vmem>>, vector<1x32xf32>
    %56 = vector.broadcast %55 : vector<1x32xf32> to vector<40x32xf32>
    %57 = arith.addf %54, %56 : vector<40x32xf32>
    %cst_30 = arith.constant 5.000000e-01 : f32
    %58 = vector.broadcast %cst_30 : f32 to vector<40x32xf32>
    %59 = arith.mulf %58, %57 : vector<40x32xf32>
    %cst_31 = arith.constant 0.707106769 : f32
    %60 = vector.broadcast %cst_31 : f32 to vector<40x32xf32>
    %61 = arith.mulf %57, %60 : vector<40x32xf32>
    %cst_32 = arith.constant 0.000000e+00 : f32
    %62 = vector.broadcast %cst_32 : f32 to vector<40x32xf32>
    %63 = arith.cmpf oge, %61, %62 : vector<40x32xf32>
    %cst_33 = arith.constant 1.000000e+00 : f32
    %cst_34 = arith.constant -1.000000e+00 : f32
    %64 = vector.broadcast %cst_33 : f32 to vector<40x32xf32>
    %65 = vector.broadcast %cst_34 : f32 to vector<40x32xf32>
    %66 = arith.select %63, %64, %65 : vector<40x32xi1>, vector<40x32xf32>
    %67 = math.absf %61 : vector<40x32xf32>
    %cst_35 = arith.constant 0.327591091 : f32
    %68 = vector.broadcast %cst_35 : f32 to vector<40x32xf32>
    %69 = arith.mulf %68, %67 : vector<40x32xf32>
    %cst_36 = arith.constant 1.000000e+00 : f32
    %70 = vector.broadcast %cst_36 : f32 to vector<40x32xf32>
    %71 = arith.addf %70, %69 : vector<40x32xf32>
    %cst_37 = arith.constant 1.000000e+00 : f32
    %72 = vector.broadcast %cst_37 : f32 to vector<40x32xf32>
    %73 = arith.divf %72, %71 : vector<40x32xf32>
    %cst_38 = arith.constant 1.06140542 : f32
    %74 = vector.broadcast %cst_38 : f32 to vector<40x32xf32>
    %75 = arith.mulf %73, %74 : vector<40x32xf32>
    %cst_39 = arith.constant -1.45315206 : f32
    %76 = vector.broadcast %cst_39 : f32 to vector<40x32xf32>
    %77 = arith.addf %76, %75 : vector<40x32xf32>
    %78 = arith.mulf %73, %77 : vector<40x32xf32>
    %cst_40 = arith.constant 1.42141378 : f32
    %79 = vector.broadcast %cst_40 : f32 to vector<40x32xf32>
    %80 = arith.addf %79, %78 : vector<40x32xf32>
    %81 = arith.mulf %73, %80 : vector<40x32xf32>
    %cst_41 = arith.constant -0.284496725 : f32
    %82 = vector.broadcast %cst_41 : f32 to vector<40x32xf32>
    %83 = arith.addf %82, %81 : vector<40x32xf32>
    %84 = arith.mulf %73, %83 : vector<40x32xf32>
    %cst_42 = arith.constant 0.254829586 : f32
    %85 = vector.broadcast %cst_42 : f32 to vector<40x32xf32>
    %86 = arith.addf %85, %84 : vector<40x32xf32>
    %87 = arith.mulf %73, %86 : vector<40x32xf32>
    %cst_43 = arith.constant 0.000000e+00 : f32
    %88 = vector.broadcast %cst_43 : f32 to vector<40x32xf32>
    %89 = arith.subf %88, %67 : vector<40x32xf32>
    %90 = arith.mulf %89, %67 : vector<40x32xf32>
    %91 = math.exp %90 : vector<40x32xf32>
    %92 = arith.mulf %87, %91 : vector<40x32xf32>
    %cst_44 = arith.constant 1.000000e+00 : f32
    %93 = vector.broadcast %cst_44 : f32 to vector<40x32xf32>
    %94 = arith.subf %93, %92 : vector<40x32xf32>
    %95 = arith.mulf %66, %94 : vector<40x32xf32>
    %cst_45 = arith.constant 1.000000e+00 : f32
    %96 = vector.broadcast %cst_45 : f32 to vector<40x32xf32>
    %97 = arith.addf %96, %95 : vector<40x32xf32>
    %98 = arith.mulf %59, %97 : vector<40x32xf32>
    %c0_46 = arith.constant 0 : index
    %c0_47 = arith.constant 0 : index
    %99 = vector.load %arg8[%c0_46, %c0_47] : memref<1x32xf32, #tpu.memory_space<vmem>>, vector<1x32xf32>
    %100 = vector.broadcast %99 : vector<1x32xf32> to vector<40x32xf32>
    %101 = arith.mulf %98, %100 : vector<40x32xf32>
    %c0_48 = arith.constant 0 : index
    %c0_49 = arith.constant 0 : index
    %102 = vector.load %arg9[%c0_48, %c0_49] : memref<1x32xf32, #tpu.memory_space<vmem>>, vector<1x32xf32>
    %103 = vector.broadcast %102 : vector<1x32xf32> to vector<40x32xf32>
    %104 = arith.addf %101, %103 : vector<40x32xf32>
    %c0_50 = arith.constant 0 : index
    %c0_51 = arith.constant 0 : index
    %105 = vector.load %arg10[%c0_50, %c0_51] : memref<32x9xf32, #tpu.memory_space<vmem>>, vector<32x9xf32>
    %cst_52 = arith.constant dense<0.000000e+00> : vector<40x9xf32>
    %106 = tpu.matmul %104, %105, %cst_52 {dimension_numbers = #tpu.dot_dimension_numbers<[1], [0], [0], [1], [0, 0, 1, 1], [], []>} : vector<40x32xf32>, vector<32x9xf32>, vector<40x9xf32> -> vector<40x9xf32>
    %c0_53 = arith.constant 0 : index
    %c0_54 = arith.constant 0 : index
    %107 = vector.load %arg11[%c0_53, %c0_54] : memref<1x9xf32, #tpu.memory_space<vmem>>, vector<1x9xf32>
    %108 = vector.broadcast %107 : vector<1x9xf32> to vector<40x9xf32>
    %109 = arith.addf %106, %108 : vector<40x9xf32>
    %c0_55 = arith.constant 0 : index
    %c0_56 = arith.constant 0 : index
    %110 = vector.load %arg12[%c0_55, %c0_56] : memref<40x9xf32, #tpu.memory_space<vmem>>, vector<40x9xf32>
    tpu.vector_store %arg12[%c0_55, %c0_56], %109 {strides = array<i32>} : memref<40x9xf32, #tpu.memory_space<vmem>>, vector<40x9xf32>,
    return
  }
  func.func @transform_0(%arg0: i32) -> (i32, i32) {
    %c0_i32 = arith.constant 0 : i32
    %c0_i32_0 = arith.constant 0 : i32
    return %arg0, %c0_i32 : i32, i32
  }
  func.func @transform_1(%arg0: i32) -> (i32, i32) {
    %c0_i32 = arith.constant 0 : i32
    %c0_i32_0 = arith.constant 0 : i32
    %c0_i32_1 = arith.constant 0 : i32
    return %c0_i32, %c0_i32_0 : i32, i32
  }
  func.func @transform_2(%arg0: i32) -> (i32, i32) {
    %c0_i32 = arith.constant 0 : i32
    %c0_i32_0 = arith.constant 0 : i32
    %c0_i32_1 = arith.constant 0 : i32
    return %c0_i32, %c0_i32_0 : i32, i32
  }
  func.func @transform_3(%arg0: i32) -> (i32, i32) {
    %c0_i32 = arith.constant 0 : i32
    %c0_i32_0 = arith.constant 0 : i32
    %c0_i32_1 = arith.constant 0 : i32
    return %c0_i32, %c0_i32_0 : i32, i32
  }
  func.func @transform_4(%arg0: i32) -> (i32, i32) {
    %c0_i32 = arith.constant 0 : i32
    %c0_i32_0 = arith.constant 0 : i32
    %c0_i32_1 = arith.constant 0 : i32
    return %c0_i32, %c0_i32_0 : i32, i32
  }
  func.func @transform_5(%arg0: i32) -> (i32, i32) {
    %c0_i32 = arith.constant 0 : i32
    %c0_i32_0 = arith.constant 0 : i32
    %c0_i32_1 = arith.constant 0 : i32
    return %c0_i32, %c0_i32_0 : i32, i32
  }
  func.func @transform_6(%arg0: i32) -> (i32, i32) {
    %c0_i32 = arith.constant 0 : i32
    %c0_i32_0 = arith.constant 0 : i32
    %c0_i32_1 = arith.constant 0 : i32
    return %c0_i32, %c0_i32_0 : i32, i32
  }
  func.func @transform_7(%arg0: i32) -> (i32, i32) {
    %c0_i32 = arith.constant 0 : i32
    %c0_i32_0 = arith.constant 0 : i32
    %c0_i32_1 = arith.constant 0 : i32
    return %c0_i32, %c0_i32_0 : i32, i32
  }
  func.func @transform_8(%arg0: i32) -> (i32, i32) {
    %c0_i32 = arith.constant 0 : i32
    %c0_i32_0 = arith.constant 0 : i32
    %c0_i32_1 = arith.constant 0 : i32
    return %c0_i32, %c0_i32_0 : i32, i32
  }
  func.func @transform_9(%arg0: i32) -> (i32, i32) {
    %c0_i32 = arith.constant 0 : i32
    %c0_i32_0 = arith.constant 0 : i32
    %c0_i32_1 = arith.constant 0 : i32
    return %c0_i32, %c0_i32_0 : i32, i32
  }
  func.func @transform_10(%arg0: i32) -> (i32, i32) {
    %c0_i32 = arith.constant 0 : i32
    %c0_i32_0 = arith.constant 0 : i32
    %c0_i32_1 = arith.constant 0 : i32
    return %c0_i32, %c0_i32_0 : i32, i32
  }
  func.func @transform_11(%arg0: i32) -> (i32, i32) {
    %c0_i32 = arith.constant 0 : i32
    %c0_i32_0 = arith.constant 0 : i32
    return %arg0, %c0_i32 : i32, i32
  }
}

</mosaic_0001>

<bundles_post_ra>
// kernel: tpu_custom_call.1
= control target key start
LH: loop header
LB: loop body
LE: loop exit
PB: predicated region body
PF: predicated region fallthrough
CT: control target
= control target key end

     0   :  { %vm65_vm0 = vcmask 1040384   ;;  %vm49_vm1 = vcmask 72704   ;;  %s1146_s1 = inlined_call_operand.vmem [shape: f32[9,32], index: 1, kind: input, shape index: {}]   ;;  %s1147_s0 = inlined_call_operand.vmem [shape: f32[40,9], index: 0, kind: input, shape index: {}]   ;;  %s1148_s2 = inlined_call_operand.vmem [shape: f32[1,32], index: 2, kind: input, shape index: {}]   ;;  %s1149_s3 = inlined_call_operand.vmem [shape: f32[1,32], index: 3, kind: input, shape index: {}]   ;;  %s1150_s4 = inlined_call_operand.vmem [shape: f32[1,32], index: 4, kind: input, shape index: {}]   ;;  %s1151_s6 = inlined_call_operand.vmem [shape: f32[1,32], index: 6, kind: input, shape index: {}]   ;;  %s1152_s7 = inlined_call_operand.vmem [shape: f32[1,32], index: 7, kind: input, shape index: {}]   ;;  %s1153_s8 = inlined_call_operand.vmem [shape: f32[1,32], index: 8, kind: input, shape index: {}]   ;;  %s1154_s5 = inlined_call_operand.vmem [shape: f32[32,32], index: 5, kind: input, shape index: {}]   ;;  %s1155_s10 = inlined_call_operand.vmem [shape: f32[1,9], index: 10, kind: input, shape index: {}]   ;;  %s1156_s9 = inlined_call_operand.vmem [shape: f32[32,9], index: 9, kind: input, shape index: {}]   ;;  %s1157_s11 = inlined_call_operand.vmem [shape: f32[40,9], index: 11, kind: output, shape index: {}]  }
   0x1   :  { %v44_v0 = vld [vmem:[%s1146_s1 + $0x8] sm:$0x1]  ;;  %v43_v1 = vld [vmem:[%s1146_s1] sm:$0xff]  ;;  %v40_v5 = vld [vmem:[%s1147_s0 + $0x10] sm:$0xff] }
   0x2   :  { %657 = vmatpush.msk.msra.mxu0 %vm65_vm0, %v44_v0  ;;  %673 = vmatpush.msk.msra.mxu1 %vm65_vm0, %v44_v0  ;;  %v38_v2 = vld [vmem:[%s1147_s0] sm:$0xff]  ;;  %v39_v4 = vld [vmem:[%s1147_s0 + $0x8] sm:$0xff]  ;;  %v41_v6 = vld [vmem:[%s1147_s0 + $0x18] sm:$0xff] }
   0x3   :  { %v42_v3 = vld [vmem:[%s1147_s0 + $0x20] sm:$0xff]  ;;  %v322_v51 = vld [vmem:[%s1154_s5 + $0x18] sm:$0xff]  ;;  %v321_v57 = vld [vmem:[%s1154_s5 + $0x10] sm:$0xff] }
   0x4   :  { %84 = vmatpush.msra.mxu0 %v43_v1  ;;  %674 = vmatpush.msra.mxu1 %v43_v1  ;;  %v684_v7 = vld [vmem:[%s1148_s2] ss:$0 sm:$0xff]  ;;  %v320_v63 = vld [vmem:[%s1154_s5 + $0x8] sm:$0xff] }
   0x5   :  { %658 = vmatmul.msk.f32.vlgmr.msra.gmra.mxu0 %vm49_vm1, %v38_v2  ;;  %662 = vmatmul.msk.f32.vlgmr.msra.gmra.mxu1 %vm49_vm1, %v42_v3  ;;  %v319_v3 = vld [vmem:[%s1154_s5] sm:$0xff] }
   0x6   :  { %355 = vmatpush.msrb.mxu1 %v322_v51  ;;  %675 = vmatpush.msra.mxu3 %v322_v51 }
   0x8   :  { %356 = vmatpush.msrb.mxu1 %v321_v57  ;;  %676 = vmatpush.msra.mxu3 %v321_v57 }
   0xa   :  { %357 = vmatpush.msrb.mxu1 %v320_v63  ;;  %677 = vmatpush.msra.mxu3 %v320_v63 }
   0xc   :  { %358 = vmatpush.msrb.mxu1 %v319_v3  ;;  %678 = vmatpush.msra.mxu3 %v319_v3 }
   0xd   :  { %659 = vmatmul.msk.f32.gmra.mxu0 %vm49_vm1, %v39_v4 }
  0x15   :  { %660 = vmatmul.msk.f32.gmra.mxu0 %vm49_vm1, %v40_v5 }
  0x1d   :  { %661 = vmatmul.msk.f32.gmra.mxu0 %vm49_vm1, %v41_v6 }
  0x82   :  { %v86_v8 = vpop.f32.mrf.mxu0  ;;  %v98_v9 = vpop.f32.mrf.mxu1 }
  0x83   :  { %v821_v10 = vadd.f32 %v684_v7, %v86_v8  ;;  %v823_v11 = vadd.f32 %v684_v7, %v98_v9 }
  0x85   :  { %v826_v12 = vmul.f32 0.70710677, %v821_v10  ;;  %v829_v13 = vmul.f32 0.70710677, %v823_v11 }
  0x87   :  { %v121_v14 = vand.u32 2147483647, %v826_v12  ;;  %v833_v15 = vand.u32 2147483647, %v829_v13  ;;  %vm111_vm0 = vcmp.ge.f32.partialorder %v826_v12, 0.0 }
  0x89   :  { %v126_v16 = vmul.f32 0.3275911, %v121_v14  ;;  %v130_v17 = vmul.f32 0.3275911, %v833_v15  ;;  %v256_v41 = vsub.f32 0.0, %v121_v14  ;;  %v260_v63 = vsub.f32 0.0, %v833_v15 }
  0x8a   :  { %v89_v18 = vpop.f32.mrf.mxu0 }
  0x8b   :  { %v131_v19 = vadd.f32 1.0, %v126_v16  ;;  %v135_v20 = vadd.f32 1.0, %v130_v17  ;;  %v836_v21 = vadd.f32 %v684_v7, %v89_v18  ;;  %v261_v55 = vmul.f32 %v256_v41, %v121_v14 }
  0x8d   :  { %691 = vrcp.f32 %v131_v19  ;;  %v839_v22 = vmul.f32 0.70710677, %v836_v21  ;;  %v145_v30 = vand.u32 2147483647, %v131_v19  ;;  %v147_v34 = vand.u32 2147483648, %v131_v19 }
  0x8e   :  { %693 = vrcp.f32 %v135_v20  ;;  %vm201_vm2 = vweird.f32 %v135_v20  ;;  %v207_v37 = vand.u32 2147483648, %v135_v20  ;;  %v205_v40 = vand.u32 2147483647, %v135_v20 }
  0x8f   :  { %v842_v23 = vand.u32 2147483647, %v839_v22  ;;  %vm141_vm5 = vweird.f32 %v131_v19  ;;  %v148_v47 = vor.u32 1.1754944e-38, %v147_v34  ;;  %vm146_vm8 = vcmp.eq.f32.partialorder %v145_v30, 8.507059e+37 }
  0x90   :  { %v208_v49 = vor.u32 1.1754944e-38, %v207_v37  ;;  %vm206_vm9 = vcmp.eq.f32.partialorder %v205_v40, 8.507059e+37  ;;  %v266_v1 = vmul.f32 1.442695, %v261_v55 }
  0x91   :  { %v127_v29 = vmul.f32 0.3275911, %v842_v23 }
  0x92   :  { %v92_v24 = vpop.f32.mrf.mxu0 }
  0x93   :  { %v692_v25 = vpop.eup %691  ;;  %v844_v26 = vadd.f32 %v684_v7, %v92_v24  ;;  %v850_v35 = vadd.f32 1.0, %v127_v29  ;;  %v257_v29 = vsub.f32 0.0, %v842_v23 }
  0x94   :  { %v694_v27 = vpop.eup %693  ;;  %v137_v28 = vmul.f32 %v692_v25, %v131_v19  ;;  %vm142_vm4 = vweird.f32 %v692_v25 }
  0x95   :  { %v197_v31 = vmul.f32 %v694_v27, %v135_v20  ;;  %v848_v32 = vmul.f32 0.70710677, %v844_v26  ;;  %vm202_vm3 = vweird.f32 %v694_v27  ;;  %695 = vrcp.f32 %v850_v35  ;;  %vm143_vm7 = vmor %vm141_vm5, %vm142_vm4 }
  0x96   :  { %v138_v33 = vsub.f32 1.0, %v137_v28  ;;  %vm857_vm6 = vmor %vm201_vm2, %vm202_vm3  ;;  %v162_v6 = vand.u32 2147483648, %v850_v35  ;;  %v160_v9 = vand.u32 2147483647, %v850_v35  ;;  %vm156_vm11 = vweird.f32 %v850_v35 }
  0x97   :  { %v198_v36 = vsub.f32 1.0, %v197_v31  ;;  %v853_v38 = vand.u32 2147483647, %v848_v32 }
  0x98   :  { %v139_v39 = vmul.f32 %v692_v25, %v138_v33  ;;  %vm161_vm13 = vcmp.eq.f32.partialorder %v160_v9, 8.507059e+37 }
  0x99   :  { %v199_v42 = vmul.f32 %v694_v27, %v198_v36  ;;  %v128_v45 = vmul.f32 0.3275911, %v853_v38 }
  0x9a   :  { %v140_v43 = vadd.f32 %v692_v25, %v139_v39  ;;  %v95_v46 = vpop.f32.mrf.mxu0 }
  0x9b   :  { %v200_v48 = vadd.f32 %v694_v27, %v199_v42  ;;  %v862_v50 = vadd.f32 %v684_v7, %v95_v46  ;;  %v867_v53 = vadd.f32 1.0, %v128_v45  ;;  %v696_v58 = vpop.eup %695  ;;  %v262_v45 = vmul.f32 %v257_v29, %v842_v23 }
  0x9c   :  { %v144_v52 = vsel %vm143_vm7, %v692_v25, %v140_v43  ;;  %v152_v62 = vmul.f32 %v696_v58, %v850_v35  ;;  %vm157_vm10 = vweird.f32 %v696_v58  ;;  %v163_v25 = vor.u32 1.1754944e-38, %v162_v6 }
  0x9d   :  { %v869_v54 = vsel %vm146_vm8, %v148_v47, %v144_v52  ;;  %v204_v56 = vsel %vm857_vm6, %v694_v27, %v200_v48  ;;  %697 = vrcp.f32 %v867_v53  ;;  %v879_v60 = vmul.f32 0.70710677, %v862_v50  ;;  %vm158_vm12 = vmor %vm156_vm11, %vm157_vm10 }
  0x9e   :  { %v211_v59 = vmul.f32 1.0614054, %v869_v54  ;;  %v881_v61 = vsel %vm206_vm9, %v208_v49, %v204_v56  ;;  %v153_v2 = vsub.f32 1.0, %v152_v62  ;;  %699 = vpow2.f32 %v266_v1 }
  0x9f   :  { %v215_v5 = vmul.f32 1.0614054, %v881_v61  ;;  %v894_v7 = vand.u32 2147483647, %v879_v60  ;;  %v177_v34 = vand.u32 2147483648, %v867_v53  ;;  %vm171_vm15 = vweird.f32 %v867_v53 }
  0xa0   :  { %v216_v0 = vadd.f32 -1.4531521, %v211_v59  ;;  %v154_v8 = vmul.f32 %v696_v58, %v153_v2  ;;  %v175_v37 = vand.u32 2147483647, %v867_v53  ;;  %v258_v49 = vsub.f32 0.0, %v853_v38 }
  0xa1   :  { %v129_v17 = vmul.f32 0.3275911, %v894_v7  ;;  %v220_v24 = vadd.f32 -1.4531521, %v215_v5  ;;  %v178_v46 = vor.u32 1.1754944e-38, %v177_v34  ;;  %v731_v23 = vmov -1.0  }
  0xa2   :  { %v221_v4 = vmul.f32 %v216_v0, %v869_v54  ;;  %v155_v18 = vadd.f32 %v696_v58, %v154_v8  ;;  %vm176_vm3 = vcmp.eq.f32.partialorder %v175_v37, 8.507059e+37  ;;  %v116_v59 = vsel %vm111_vm0, 1.0, %v731_v23  ;;  %v946_v37 = vld [vmem:[%s1150_s4] ss:$0 sm:$0xff] }
  0xa3   :  { %v698_v14 = vpop.eup %697  ;;  %v901_v27 = vadd.f32 1.0, %v129_v17  ;;  %v225_v40 = vmul.f32 %v220_v24, %v881_v61  ;;  %v268_v0 = vmul.f32 1.442695, %v262_v45  ;;  %v263_v2 = vmul.f32 %v258_v49, %v853_v38  ;;  %v937_v38 = vld [vmem:[%s1149_s3] ss:$0 sm:$0xff] }
  0xa4   :  { %v226_v16 = vadd.f32 1.4214138, %v221_v4  ;;  %v167_v19 = vmul.f32 %v698_v14, %v867_v53  ;;  %v159_v28 = vsel %vm158_vm12, %v696_v58, %v155_v18  ;;  %vm172_vm14 = vweird.f32 %v698_v14  ;;  %v700_v41 = vpop.eup %699 }
  0xa5   :  { %v904_v33 = vsel %vm161_vm13, %v163_v25, %v159_v28  ;;  %701 = vrcp.f32 %v901_v27  ;;  %vm173_vm2 = vmor %vm171_vm15, %vm172_vm14  ;;  %v230_v55 = vadd.f32 1.4214138, %v225_v40  ;;  %v190_v6 = vand.u32 2147483647, %v901_v27 }
  0xa6   :  { %v231_v20 = vmul.f32 %v226_v16, %v869_v54  ;;  %v168_v30 = vsub.f32 1.0, %v167_v19  ;;  %v212_v35 = vmul.f32 1.0614054, %v904_v33  ;;  %v192_v8 = vand.u32 2147483648, %v901_v27 }
  0xa7   :  { %v235_v5 = vmul.f32 %v230_v55, %v881_v61  ;;  %v101_v16 = vmul.f32 0.5, %v821_v10  ;;  %v265_v18 = vmul.f32 %v260_v63, %v833_v15  ;;  %703 = vpow2.f32 %v268_v0 }
  0xa8   :  { %v236_v31 = vadd.f32 -0.28449672, %v231_v20  ;;  %v169_v36 = vmul.f32 %v698_v14, %v168_v30  ;;  %v217_v42 = vadd.f32 -1.4531521, %v212_v35  ;;  %vm186_vm5 = vweird.f32 %v901_v27 }
  0xa9   :  { %v240_v28 = vadd.f32 -0.28449672, %v235_v5  ;;  %v270_v29 = vmul.f32 1.442695, %v263_v2  ;;  %v193_v10 = vor.u32 1.1754944e-38, %v192_v8  ;;  %vm191_vm7 = vcmp.eq.f32.partialorder %v190_v6, 8.507059e+37 }
  0xaa   :  { %v241_v39 = vmul.f32 %v236_v31, %v869_v54  ;;  %v170_v43 = vadd.f32 %v698_v14, %v169_v36  ;;  %v222_v47 = vmul.f32 %v217_v42, %v904_v33  ;;  %v259_v36 = vsub.f32 0.0, %v894_v7 }
  0xab   :  { %v702_v51 = vpop.eup %701  ;;  %vm112_vm8 = vcmp.ge.f32.partialorder %v839_v22, 0.0  ;;  %705 = vpow2.f32 %v270_v29  ;;  %vm327_vm9 = vcmask 261120   ;;  %vm113_vm10 = vcmp.ge.f32.partialorder %v848_v32, 0.0 }
  0xac   :  { %v246_v44 = vadd.f32 0.2548296, %v241_v39  ;;  %v174_v48 = vsel %vm173_vm2, %v698_v14, %v170_v43  ;;  %v227_v53 = vadd.f32 1.4214138, %v222_v47  ;;  %v182_v58 = vmul.f32 %v702_v51, %v901_v27 }
  0xad   :  { %v918_v56 = vsel %vm176_vm3, %v178_v46, %v174_v48  ;;  %vm187_vm4 = vweird.f32 %v702_v51  ;;  %v274_v27 = vmul.f32 1.442695, %v265_v18  ;;  %v704_v42 = vpop.eup %703  ;;  %v264_v48 = vmul.f32 %v259_v36, %v894_v7 }
  0xae   :  { %v251_v52 = vmul.f32 %v246_v44, %v869_v54  ;;  %v213_v57 = vmul.f32 1.0614054, %v918_v56  ;;  %v232_v1 = vmul.f32 %v227_v53, %v904_v33  ;;  %v183_v3 = vsub.f32 1.0, %v182_v58  ;;  %vm188_vm6 = vmor %vm186_vm5, %vm187_vm4 }
  0xaf   :  { %v245_v44 = vmul.f32 %v240_v28, %v881_v61  ;;  %707 = vpow2.f32 %v274_v27  ;;  %v117_v55 = vsel %vm112_vm8, 1.0, %v731_v23  ;;  %v272_v63 = vmul.f32 1.442695, %v264_v48 }
  0xb0   :  { %v276_v62 = vmul.f32 %v700_v41, %v251_v52  ;;  %v218_v54 = vadd.f32 -1.4531521, %v213_v57  ;;  %v237_v9 = vadd.f32 -0.28449672, %v232_v1  ;;  %v184_v14 = vmul.f32 %v702_v51, %v183_v3 }
  0xb1   :  { %v250_v22 = vadd.f32 0.2548296, %v245_v44  ;;  %v118_v6 = vsel %vm113_vm10, 1.0, %v731_v23  ;;  %709 = vpow2.f32 %v272_v63  ;;  %vm115_vm11 = vcmp.ge.f32.partialorder %v829_v13, 0.0 }
  0xb2   :  { %v281_v4 = vsub.f32 1.0, %v276_v62  ;;  %v223_v12 = vmul.f32 %v218_v54, %v918_v56  ;;  %v242_v19 = vmul.f32 %v237_v9, %v904_v33  ;;  %v185_v24 = vadd.f32 %v702_v51, %v184_v14 }
  0xb3   :  { %v102_v62 = vmul.f32 0.5, %v836_v21  ;;  %v255_v54 = vmul.f32 %v250_v22, %v881_v61  ;;  %v103_v21 = vmul.f32 0.5, %v844_v26  ;;  %vm114_vm12 = vcmp.ge.f32.partialorder %v879_v60, 0.0 }
  0xb4   :  { %v286_v17 = vmul.f32 %v281_v4, %v116_v59  ;;  %v228_v20 = vadd.f32 1.4214138, %v223_v12  ;;  %v247_v30 = vadd.f32 0.2548296, %v242_v19  ;;  %v189_v31 = vsel %vm188_vm6, %v702_v51, %v185_v24  ;;  %v706_v59 = vpop.eup %705 }
  0xb5   :  { %v194_v35 = vsel %vm191_vm7, %v193_v10, %v189_v31  ;;  %v708_v5 = vpop.eup %707  ;;  %v120_v28 = vsel %vm115_vm11, 1.0, %v731_v23  ;;  %v119_v29 = vsel %vm114_vm12, 1.0, %v731_v23  ;;  %v105_v60 = vmul.f32 0.5, %v823_v11 }
  0xb6   :  { %v291_v25 = vadd.f32 1.0, %v286_v17  ;;  %v233_v15 = vmul.f32 %v228_v20, %v918_v56  ;;  %v252_v39 = vmul.f32 %v247_v30, %v904_v33  ;;  %v214_v41 = vmul.f32 1.0614054, %v194_v35 }
  0xb7   :  { %v280_v12 = vmul.f32 %v708_v5, %v255_v54  ;;  %v710_v18 = vpop.eup %709  ;;  %v596_v54 = vld [vmem:[%s1156_s9 + $0x18] sm:$0xff]  ;;  %v595_v5 = vld [vmem:[%s1156_s9 + $0x10] sm:$0xff] }
  0xb8   :  { %v296_v34 = vmul.f32 %v291_v25, %v101_v16  ;;  %v238_v40 = vadd.f32 -0.28449672, %v233_v15  ;;  %v277_v45 = vmul.f32 %v704_v42, %v252_v39  ;;  %v219_v47 = vadd.f32 -1.4531521, %v214_v41  ;;  %628 = vmatpush.msra.mxu1 %v596_v54  ;;  %679 = vmatpush.msra.mxu2 %v596_v54 }
  0xb9   :  { %v285_v19 = vsub.f32 1.0, %v280_v12  ;;  %v104_v15 = vmul.f32 0.5, %v862_v50  ;;  %v984_v50 = vld [vmem:[%s1151_s6] ss:$0 sm:$0xff] }
  0xba   :  { %v305_v43 = vmul.f32 %v937_v38, %v296_v34  ;;  %v243_v46 = vmul.f32 %v238_v40, %v918_v56  ;;  %v282_v33 = vsub.f32 1.0, %v277_v45  ;;  %v224_v52 = vmul.f32 %v219_v47, %v194_v35  ;;  %629 = vmatpush.msra.mxu1 %v595_v5  ;;  %680 = vmatpush.msra.mxu2 %v595_v5 }
  0xbb   :  { %v290_v10 = vmul.f32 %v285_v19, %v120_v28 }
  0xbc   :  { %v314_v49 = vadd.f32 %v946_v37, %v305_v43  ;;  %v248_v51 = vadd.f32 0.2548296, %v243_v46  ;;  %v287_v53 = vmul.f32 %v282_v33, %v117_v55  ;;  %v229_v58 = vadd.f32 1.4214138, %v224_v52 }
  0xbd   :  { %v295_v13 = vadd.f32 1.0, %v290_v10 }
  0xbe   :  { %663 = vmatmul.msk.f32.vlgmr.msrb.gmra.mxu1 %vm327_vm9, %v314_v49  ;;  %v253_v57 = vmul.f32 %v248_v51, %v918_v56  ;;  %v292_v7 = vadd.f32 1.0, %v287_v53  ;;  %v234_v1 = vmul.f32 %v229_v58, %v194_v35 }
  0xbf   :  { %v300_v36 = vmul.f32 %v295_v13, %v105_v60 }
  0xc0   :  { %v278_v0 = vmul.f32 %v706_v59, %v253_v57  ;;  %v297_v2 = vmul.f32 %v292_v7, %v102_v62  ;;  %v239_v4 = vadd.f32 -0.28449672, %v234_v1 }
  0xc1   :  { %v309_v39 = vmul.f32 %v937_v38, %v300_v36 }
  0xc2   :  { %v283_v3 = vsub.f32 1.0, %v278_v0  ;;  %v244_v8 = vmul.f32 %v239_v4, %v194_v35  ;;  %v306_v9 = vmul.f32 %v937_v38, %v297_v2 }
  0xc3   :  { %v318_v40 = vadd.f32 %v946_v37, %v309_v39 }
  0xc4   :  { %v288_v56 = vmul.f32 %v283_v3, %v118_v6  ;;  %v249_v32 = vadd.f32 0.2548296, %v244_v8  ;;  %v315_v16 = vadd.f32 %v946_v37, %v306_v9  ;;  %v594_v8 = vld [vmem:[%s1156_s9 + $0x8] sm:$0xff] }
  0xc5   :  { %630 = vmatpush.msra.mxu1 %v594_v8  ;;  %681 = vmatpush.msra.mxu2 %v594_v8 }
  0xc6   :  { %v293_v14 = vadd.f32 1.0, %v288_v56  ;;  %v254_v61 = vmul.f32 %v249_v32, %v194_v35  ;;  %664 = vmatmul.msk.f32.vlgmr.msra.gmra.mxu3 %vm327_vm9, %v315_v16 }
  0xc8   :  { %v298_v17 = vmul.f32 %v293_v14, %v103_v21  ;;  %v279_v20 = vmul.f32 %v710_v18, %v254_v61 }
  0xca   :  { %v307_v24 = vmul.f32 %v937_v38, %v298_v17  ;;  %v284_v25 = vsub.f32 1.0, %v279_v20  ;;  %v593_v17 = vld [vmem:[%s1156_s9] sm:$0xff] }
  0xcb   :  { %631 = vmatpush.msra.mxu1 %v593_v17  ;;  %682 = vmatpush.msra.mxu2 %v593_v17 }
  0xcc   :  { %v316_v26 = vadd.f32 %v946_v37, %v307_v24  ;;  %v289_v30 = vmul.f32 %v284_v25, %v119_v29 }
  0xce   :  { %v294_v31 = vadd.f32 1.0, %v289_v30  ;;  %665 = vmatmul.msk.f32.gmra.mxu3 %vm327_vm9, %v316_v26 }
  0xd0   :  { %v299_v34 = vmul.f32 %v294_v31, %v104_v15 }
  0xd2   :  { %v308_v35 = vmul.f32 %v937_v38, %v299_v34 }
  0xd4   :  { %v317_v27 = vadd.f32 %v946_v37, %v308_v35 }
  0xd6   :  { %666 = vmatmul.msk.f32.gmra.mxu3 %vm327_vm9, %v317_v27 }
  0xde   :  { %667 = vmatmul.msk.f32.gmra.mxu3 %vm327_vm9, %v318_v40 }
 0x13b   :  { %v360_v41 = vpop.f32.mrf.mxu1 }
 0x13c   :  { %v987_v11 = vadd.f32 %v984_v50, %v360_v41 }
 0x13e   :  { %v990_v42 = vmul.f32 0.70710677, %v987_v11 }
 0x140   :  { %v395_v43 = vand.u32 2147483647, %v990_v42  ;;  %vm385_vm6 = vcmp.ge.f32.partialorder %v990_v42, 0.0 }
 0x142   :  { %v400_v44 = vmul.f32 0.3275911, %v395_v43  ;;  %v530_v58 = vsub.f32 0.0, %v395_v43 }
 0x144   :  { %v405_v38 = vadd.f32 1.0, %v400_v44  ;;  %v535_v4 = vmul.f32 %v530_v58, %v395_v43 }
 0x146   :  { %711 = vrcp.f32 %v405_v38  ;;  %v421_v33 = vand.u32 2147483648, %v405_v38  ;;  %v419_v52 = vand.u32 2147483647, %v405_v38  ;;  %vm415_vm14 = vweird.f32 %v405_v38 }
 0x147   :  { %v540_v32 = vmul.f32 1.442695, %v535_v4 }
 0x148   :  { %v422_v57 = vor.u32 1.1754944e-38, %v421_v33  ;;  %vm420_vm0 = vcmp.eq.f32.partialorder %v419_v52, 8.507059e+37 }
 0x149   :  { %v363_v45 = vpop.f32.mrf.mxu3 }
 0x14a   :  { %v994_v47 = vadd.f32 %v984_v50, %v363_v45 }
 0x14c   :  { %v712_v37 = vpop.eup %711  ;;  %v997_v49 = vmul.f32 0.70710677, %v994_v47 }
 0x14d   :  { %v411_v46 = vmul.f32 %v712_v37, %v405_v38  ;;  %vm416_vm13 = vweird.f32 %v712_v37 }
 0x14e   :  { %v1000_v55 = vand.u32 2147483647, %v997_v49  ;;  %vm417_vm15 = vmor %vm415_vm14, %vm416_vm13  ;;  %vm386_vm14 = vcmp.ge.f32.partialorder %v997_v49, 0.0 }
 0x14f   :  { %v412_v48 = vsub.f32 1.0, %v411_v46 }
 0x150   :  { %v401_v53 = vmul.f32 0.3275911, %v1000_v55  ;;  %v531_v31 = vsub.f32 0.0, %v1000_v55 }
 0x151   :  { %v413_v51 = vmul.f32 %v712_v37, %v412_v48  ;;  %v366_v59 = vpop.f32.mrf.mxu3 }
 0x152   :  { %v406_v63 = vadd.f32 1.0, %v401_v53  ;;  %v1004_v7 = vadd.f32 %v984_v50, %v366_v59  ;;  %v536_v45 = vmul.f32 %v531_v31, %v1000_v55 }
 0x153   :  { %v414_v22 = vadd.f32 %v712_v37, %v413_v51 }
 0x154   :  { %713 = vrcp.f32 %v406_v63  ;;  %v1010_v2 = vmul.f32 0.70710677, %v1004_v7  ;;  %v436_v26 = vand.u32 2147483648, %v406_v63  ;;  %v434_v29 = vand.u32 2147483647, %v406_v63 }
 0x155   :  { %v418_v62 = vsel %vm417_vm15, %v712_v37, %v414_v22  ;;  %vm430_vm3 = vweird.f32 %v406_v63  ;;  %v542_v58 = vmul.f32 1.442695, %v536_v45 }
 0x156   :  { %v423_v0 = vsel %vm420_vm0, %v422_v57, %v418_v62  ;;  %v1016_v6 = vand.u32 2147483647, %v1010_v2  ;;  %v437_v35 = vor.u32 1.1754944e-38, %v436_v26  ;;  %vm435_vm5 = vcmp.eq.f32.partialorder %v434_v29, 8.507059e+37 }
 0x157   :  { %v485_v1 = vmul.f32 1.0614054, %v423_v0  ;;  %v390_v57 = vsel %vm385_vm6, 1.0, %v731_v23  ;;  %vm387_vm6 = vcmp.ge.f32.partialorder %v1010_v2, 0.0  ;;  %v377_v2 = vmul.f32 0.5, %v1004_v7 }
 0x158   :  { %v402_v9 = vmul.f32 0.3275911, %v1016_v6 }
 0x159   :  { %v490_v3 = vadd.f32 -1.4531521, %v485_v1  ;;  %v369_v21 = vpop.f32.mrf.mxu3  ;;  %v375_v1 = vmul.f32 0.5, %v987_v11 }
 0x15a   :  { %v714_v12 = vpop.eup %713  ;;  %v1023_v16 = vadd.f32 %v984_v50, %v369_v21  ;;  %v1028_v18 = vadd.f32 1.0, %v402_v9 }
 0x15b   :  { %v495_v56 = vmul.f32 %v490_v3, %v423_v0  ;;  %v426_v61 = vmul.f32 %v714_v12, %v406_v63  ;;  %vm431_vm2 = vweird.f32 %v714_v12  ;;  %v532_v63 = vsub.f32 0.0, %v1016_v6 }
 0x15c   :  { %v1031_v20 = vmul.f32 0.70710677, %v1023_v16  ;;  %715 = vrcp.f32 %v1028_v18  ;;  %vm432_vm4 = vmor %vm430_vm3, %vm431_vm2  ;;  %v449_v53 = vand.u32 2147483647, %v1028_v18  ;;  %vm445_vm8 = vweird.f32 %v1028_v18 }
 0x15d   :  { %v500_v14 = vadd.f32 1.4214138, %v495_v56  ;;  %v427_v24 = vsub.f32 1.0, %v426_v61  ;;  %717 = vpow2.f32 %v540_v32  ;;  %v1068_v56 = vld [vmem:[%s1152_s7] ss:$0 sm:$0xff]  ;;  %v537_v61 = vmul.f32 %v532_v63, %v1016_v6 }
 0x15e   :  { %v1035_v10 = vand.u32 2147483647, %v1031_v20  ;;  %vm450_vm11 = vcmp.eq.f32.partialorder %v449_v53, 8.507059e+37  ;;  %v1077_v32 = vld [vmem:[%s1153_s8] ss:$0 sm:$0xff] }
 0x15f   :  { %v505_v19 = vmul.f32 %v500_v14, %v423_v0  ;;  %v428_v28 = vmul.f32 %v714_v12, %v427_v24 }
 0x160   :  { %v403_v13 = vmul.f32 0.3275911, %v1035_v10 }
 0x161   :  { %v510_v25 = vadd.f32 -0.28449672, %v505_v19  ;;  %v429_v15 = vadd.f32 %v714_v12, %v428_v28  ;;  %v372_v34 = vpop.f32.mrf.mxu3 }
 0x162   :  { %v716_v36 = vpop.eup %715  ;;  %v1039_v39 = vadd.f32 1.0, %v403_v13  ;;  %v1042_v40 = vadd.f32 %v984_v50, %v372_v34  ;;  %v451_v50 = vand.u32 2147483648, %v1028_v18 }
 0x163   :  { %v515_v30 = vmul.f32 %v510_v25, %v423_v0  ;;  %v433_v27 = vsel %vm432_vm4, %v714_v12, %v429_v15  ;;  %v718_v41 = vpop.eup %717  ;;  %v441_v38 = vmul.f32 %v716_v36, %v1028_v18  ;;  %vm446_vm7 = vweird.f32 %v716_v36 }
 0x164   :  { %v1044_v44 = vsel %vm435_vm5, %v437_v35, %v433_v27  ;;  %719 = vrcp.f32 %v1039_v39  ;;  %v1053_v51 = vmul.f32 0.70710677, %v1042_v40  ;;  %vm447_vm10 = vmor %vm445_vm8, %vm446_vm7  ;;  %v452_v3 = vor.u32 1.1754944e-38, %v451_v50 }
 0x165   :  { %v520_v60 = vadd.f32 0.2548296, %v515_v30  ;;  %v486_v37 = vmul.f32 1.0614054, %v1044_v44  ;;  %v442_v48 = vsub.f32 1.0, %v441_v38  ;;  %721 = vpow2.f32 %v542_v58 }
 0x166   :  { %v1059_v42 = vand.u32 2147483647, %v1053_v51  ;;  %v464_v24 = vand.u32 2147483647, %v1039_v39  ;;  %v466_v25 = vand.u32 2147483648, %v1039_v39  ;;  %vm460_vm13 = vweird.f32 %v1039_v39 }
 0x167   :  { %v525_v43 = vmul.f32 %v520_v60, %v423_v0  ;;  %v491_v33 = vadd.f32 -1.4531521, %v486_v37  ;;  %v443_v22 = vmul.f32 %v716_v36, %v442_v48  ;;  %v533_v37 = vsub.f32 0.0, %v1035_v10 }
 0x168   :  { %v404_v4 = vmul.f32 0.3275911, %v1059_v42  ;;  %v467_v60 = vor.u32 1.1754944e-38, %v466_v25  ;;  %vm465_vm0 = vcmp.eq.f32.partialorder %v464_v24, 8.507059e+37  ;;  %v391_v48 = vsel %vm386_vm14, 1.0, %v731_v23 }
 0x169   :  { %v550_v46 = vmul.f32 %v718_v41, %v525_v43  ;;  %v496_v55 = vmul.f32 %v491_v33, %v1044_v44  ;;  %v444_v62 = vadd.f32 %v716_v36, %v443_v22  ;;  %vm388_vm7 = vcmp.ge.f32.partialorder %v1031_v20, 0.0 }
 0x16a   :  { %v720_v0 = vpop.eup %719  ;;  %v1072_v11 = vadd.f32 1.0, %v404_v4  ;;  %vm389_vm8 = vcmp.ge.f32.partialorder %v1053_v51, 0.0  ;;  %v690_v51 = vld [vmem:[%s1155_s10] ss:$0 sm:$0xff] }
 0x16b   :  { %v555_v52 = vsub.f32 1.0, %v550_v46  ;;  %v501_v54 = vadd.f32 1.4214138, %v496_v55  ;;  %v448_v8 = vsel %vm447_vm10, %v716_v36, %v444_v62  ;;  %v456_v9 = vmul.f32 %v720_v0, %v1039_v39  ;;  %v722_v6 = vpop.eup %721 }
 0x16c   :  { %v453_v12 = vsel %vm450_vm11, %v452_v3, %v448_v8  ;;  %723 = vrcp.f32 %v1072_v11  ;;  %vm461_vm12 = vweird.f32 %v720_v0  ;;  %v544_v36 = vmul.f32 1.442695, %v537_v61 }
 0x16d   :  { %v560_v59 = vmul.f32 %v555_v52, %v390_v57  ;;  %v506_v21 = vmul.f32 %v501_v54, %v1044_v44  ;;  %v487_v17 = vmul.f32 1.0614054, %v453_v12  ;;  %v457_v18 = vsub.f32 1.0, %v456_v9  ;;  %vm462_vm15 = vmor %vm460_vm13, %vm461_vm12 }
 0x16e   :  { %725 = vpow2.f32 %v544_v36  ;;  %v538_v57 = vmul.f32 %v533_v37, %v1035_v10  ;;  %v481_v55 = vand.u32 2147483648, %v1072_v11  ;;  %vm475_vm3 = vweird.f32 %v1072_v11 }
 0x16f   :  { %v565_v5 = vadd.f32 1.0, %v560_v59  ;;  %v511_v19 = vadd.f32 -0.28449672, %v506_v21  ;;  %v492_v28 = vadd.f32 -1.4531521, %v487_v17  ;;  %v458_v29 = vmul.f32 %v720_v0, %v457_v18 }
 0x170   :  { %v376_v54 = vmul.f32 0.5, %v994_v47  ;;  %v546_v4 = vmul.f32 1.442695, %v538_v57  ;;  %v482_v10 = vor.u32 1.1754944e-38, %v481_v55  ;;  %v534_v61 = vsub.f32 0.0, %v1059_v42 }
 0x171   :  { %v570_v14 = vmul.f32 %v565_v5, %v375_v1  ;;  %v516_v30 = vmul.f32 %v511_v19, %v1044_v44  ;;  %v497_v31 = vmul.f32 %v492_v28, %v453_v12  ;;  %v459_v13 = vadd.f32 %v720_v0, %v458_v29 }
 0x172   :  { %v724_v41 = vpop.eup %723  ;;  %727 = vpow2.f32 %v546_v4  ;;  %v539_v28 = vmul.f32 %v534_v61, %v1059_v42  ;;  %v394_v55 = vsel %vm389_vm8, 1.0, %v731_v23 }
 0x173   :  { %v579_v26 = vmul.f32 %v1068_v56, %v570_v14  ;;  %v521_v34 = vadd.f32 0.2548296, %v516_v30  ;;  %v502_v35 = vadd.f32 1.4214138, %v497_v31  ;;  %v463_v27 = vsel %vm462_vm15, %v720_v0, %v459_v13 }
 0x174   :  { %v468_v38 = vsel %vm465_vm0, %v467_v60, %v463_v27  ;;  %v471_v46 = vmul.f32 %v724_v41, %v1072_v11  ;;  %vm476_vm2 = vweird.f32 %v724_v41  ;;  %v726_v5 = vpop.eup %725 }
 0x175   :  { %v588_v15 = vadd.f32 %v1077_v32, %v579_v26  ;;  %v526_v43 = vmul.f32 %v521_v34, %v1044_v44  ;;  %v507_v45 = vmul.f32 %v502_v35, %v453_v12  ;;  %v488_v39 = vmul.f32 1.0614054, %v468_v38  ;;  %vm477_vm4 = vmor %vm475_vm3, %vm476_vm2 }
 0x176   :  { %v472_v22 = vsub.f32 1.0, %v471_v46  ;;  %v479_v44 = vand.u32 2147483647, %v1072_v11  ;;  %v548_v35 = vmul.f32 1.442695, %v539_v28 }
 0x177   :  { %668 = vmatmul.msk.f32.vlgmr.msra.gmra.mxu1 %vm327_vm9, %v588_v15  ;;  %v551_v33 = vmul.f32 %v722_v6, %v526_v43  ;;  %v512_v50 = vadd.f32 -0.28449672, %v507_v45  ;;  %v493_v52 = vadd.f32 -1.4531521, %v488_v39  ;;  %v393_v45 = vsel %vm388_vm7, 1.0, %v731_v23 }
 0x178   :  { %v473_v62 = vmul.f32 %v724_v41, %v472_v22  ;;  %vm480_vm5 = vcmp.eq.f32.partialorder %v479_v44, 8.507059e+37  ;;  %v728_v60 = vpop.eup %727  ;;  %729 = vpow2.f32 %v548_v35 }
 0x179   :  { %v556_v53 = vsub.f32 1.0, %v551_v33  ;;  %v517_v58 = vmul.f32 %v512_v50, %v453_v12  ;;  %v498_v59 = vmul.f32 %v493_v52, %v468_v38 }
 0x17a   :  { %v474_v1 = vadd.f32 %v724_v41, %v473_v62 }
 0x17b   :  { %v561_v63 = vmul.f32 %v556_v53, %v391_v48  ;;  %v522_v0 = vadd.f32 0.2548296, %v517_v58  ;;  %v503_v49 = vadd.f32 1.4214138, %v498_v59 }
 0x17c   :  { %v478_v21 = vsel %vm477_vm4, %v724_v41, %v474_v1 }
 0x17d   :  { %v566_v3 = vadd.f32 1.0, %v561_v63  ;;  %v527_v8 = vmul.f32 %v522_v0, %v453_v12  ;;  %v508_v9 = vmul.f32 %v503_v49, %v468_v38  ;;  %v483_v17 = vsel %vm480_vm5, %v482_v10, %v478_v21 }
 0x17e   :  { %v489_v11 = vmul.f32 1.0614054, %v483_v17  ;;  %v392_v12 = vsel %vm387_vm6, 1.0, %v731_v23  ;;  %v730_v52 = vpop.eup %729 }
 0x17f   :  { %v571_v14 = vmul.f32 %v566_v3, %v376_v54  ;;  %v552_v18 = vmul.f32 %v726_v5, %v527_v8  ;;  %v513_v19 = vadd.f32 -0.28449672, %v508_v9 }
 0x180   :  { %v494_v26 = vadd.f32 -1.4531521, %v489_v11 }
 0x181   :  { %v580_v47 = vmul.f32 %v1068_v56, %v571_v14  ;;  %v557_v24 = vsub.f32 1.0, %v552_v18  ;;  %v518_v25 = vmul.f32 %v513_v19, %v468_v38 }
 0x182   :  { %v499_v31 = vmul.f32 %v494_v26, %v483_v17 }
 0x183   :  { %v589_v29 = vadd.f32 %v1077_v32, %v580_v47  ;;  %v562_v30 = vmul.f32 %v557_v24, %v392_v12  ;;  %v523_v15 = vadd.f32 0.2548296, %v518_v25 }
 0x184   :  { %v504_v34 = vadd.f32 1.4214138, %v499_v31 }
 0x185   :  { %669 = vmatmul.msk.f32.vlgmr.msra.gmra.mxu2 %vm327_vm9, %v589_v29  ;;  %v567_v13 = vadd.f32 1.0, %v562_v30  ;;  %v528_v6 = vmul.f32 %v523_v15, %v468_v38  ;;  %v378_v38 = vmul.f32 0.5, %v1023_v16  ;;  %v379_v16 = vmul.f32 0.5, %v1042_v40 }
 0x186   :  { %v509_v41 = vmul.f32 %v504_v34, %v483_v17 }
 0x187   :  { %v572_v36 = vmul.f32 %v567_v13, %v377_v2  ;;  %v553_v27 = vmul.f32 %v728_v60, %v528_v6 }
 0x188   :  { %v514_v43 = vadd.f32 -0.28449672, %v509_v41 }
 0x189   :  { %v558_v42 = vsub.f32 1.0, %v553_v27  ;;  %v581_v37 = vmul.f32 %v1068_v56, %v572_v36 }
 0x18a   :  { %v519_v46 = vmul.f32 %v514_v43, %v483_v17 }
 0x18b   :  { %v563_v39 = vmul.f32 %v558_v42, %v393_v45  ;;  %v590_v7 = vadd.f32 %v1077_v32, %v581_v37 }
 0x18c   :  { %v524_v33 = vadd.f32 0.2548296, %v519_v46 }
 0x18d   :  { %v568_v48 = vadd.f32 1.0, %v563_v39  ;;  %670 = vmatmul.msk.f32.gmra.mxu2 %vm327_vm9, %v590_v7 }
 0x18e   :  { %v529_v50 = vmul.f32 %v524_v33, %v483_v17 }
 0x18f   :  { %v573_v20 = vmul.f32 %v568_v48, %v378_v38 }
 0x190   :  { %v554_v22 = vmul.f32 %v730_v52, %v529_v50 }
 0x191   :  { %v582_v53 = vmul.f32 %v1068_v56, %v573_v20 }
 0x192   :  { %v559_v57 = vsub.f32 1.0, %v554_v22 }
 0x193   :  { %v591_v44 = vadd.f32 %v1077_v32, %v582_v53 }
 0x194   :  { %v564_v58 = vmul.f32 %v559_v57, %v394_v55 }
 0x195   :  { %671 = vmatmul.msk.f32.gmra.mxu2 %vm327_vm9, %v591_v44 }
 0x196   :  { %v569_v59 = vadd.f32 1.0, %v564_v58 }
 0x198   :  { %v574_v62 = vmul.f32 %v569_v59, %v379_v16 }
 0x19a   :  { %v583_v63 = vmul.f32 %v1068_v56, %v574_v62 }
 0x19c   :  { %v592_v0 = vadd.f32 %v1077_v32, %v583_v63 }
 0x19e   :  { %672 = vmatmul.msk.f32.gmra.mxu2 %vm327_vm9, %v592_v0 }
 0x1f4   :  { %v633_v49 = vpop.f32.mrf.mxu1 }
 0x1f5   :  { %v634_v1 = vadd.f32 %v690_v51, %v633_v49 }
 0x1f7   :  { %648 = vst.msk [vmem:[%s1157_s11] sm:$0xff] %vm49_vm1, %v634_v1 }
 0x208   :  { %v636_v23 = vpop.f32.mrf.mxu2 }
 0x209   :  { %v637_v40 = vadd.f32 %v690_v51, %v636_v23 }
 0x20b   :  { %649 = vst.msk [vmem:[%s1157_s11 + $0x8] sm:$0xff] %vm49_vm1, %v637_v40 }
 0x210   :  { %v639_v56 = vpop.f32.mrf.mxu2 }
 0x211   :  { %v640_v32 = vadd.f32 %v690_v51, %v639_v56 }
 0x213   :  { %650 = vst.msk [vmem:[%s1157_s11 + $0x10] sm:$0xff] %vm49_vm1, %v640_v32 }
 0x218   :  { %v642_v54 = vpop.f32.mrf.mxu2 }
 0x219   :  { %v643_v3 = vadd.f32 %v690_v51, %v642_v54 }
 0x21b   :  { %651 = vst.msk [vmem:[%s1157_s11 + $0x18] sm:$0xff] %vm49_vm1, %v643_v3 }
 0x221   :  { %v645_v4 = vpop.f32.mrf.mxu2 }
 0x222   :  { %v646_v10 = vadd.f32 %v690_v51, %v645_v4 }
 0x224   :  { %652 = vst.msk [vmem:[%s1157_s11 + $0x20] sm:$0xff] %vm49_vm1, %v646_v10 }

</bundles_post_ra>
